<compile_context>
chip_gen: v6e
topology: v6e:2x2x1
jax: 0.10.0
libtpu: 0.0.40
codegen_flags: <defaults>
</compile_context>

<pallas_src>
import jax
import jax.numpy as jnp
import numpy as np
from jax import lax
from jax.experimental import pallas as pl
from jax.experimental.pallas import tpu as pltpu


def _lstm_kernel(x_ref, wih_ref, whh_ref, b_ref, h_out_ref, pre_ref):
    """One batch-chunk LSTM recurrence (whole sequence resident in VMEM).

    x_ref    : (T*BB, F)   time-major rows for this chunk (row = t*BB + b)
    wih_ref  : (F, 4H)     W_ih^T
    whh_ref  : (H, 4H)     W_hh^T
    b_ref    : (1, 4H)     b_ih + b_hh
    h_out_ref: (BB, H)     final hidden state for this chunk
    pre_ref  : (T*BB, 4H)  VMEM scratch holding the staged input projection
    Gate order follows PyTorch nn.LSTM: [i, f, g, o].
    """
    BB, H = h_out_ref.shape
    TBB = x_ref.shape[0]
    T = TBB // BB
    H4 = 4 * H

    # ---- Prologue: hoist the non-recurrent projection off the serial path.
    # One lane-dense MXU pass for all timesteps of this chunk, staged into
    # VMEM scratch so vreg live ranges stay bounded regardless of T.
    pre_ref[...] = (
        jnp.dot(x_ref[...], wih_ref[...], preferred_element_type=jnp.float32)
        + b_ref[...]
    )

    # W_hh^T resident for the whole recurrence.
    # TODO(synk): hold W_hh stationary in the MXU weight registers
    # (pltpu.matmul_push_rhs once + per-step matmul_acc_lhs/matmul_pop) to cut
    # the per-step RHS push off the serial chain; kept jnp.dot because the
    # explicit-MXU accumulator-reset semantics could not be validated here.
    whh = whh_ref[...]

    # Hoisted lane constants (broadcast_in_dim is not CSE'd by JAX).
    # sigmoid(x) = 0.5*tanh(x/2) + 0.5 on i/f/o lanes, tanh(x) on g lanes:
    # pre-scale the gates, one full-vreg tanh, then one affine th*scale+offset.
    lane = lax.broadcasted_iota(jnp.int32, (BB, H4), 1)
    g_mask = (lane >= 2 * H) & (lane < 3 * H)
    scale = jnp.where(g_mask, 1.0, 0.5).astype(jnp.float32)   # pre & post tanh
    offset = jnp.where(g_mask, 0.0, 0.5).astype(jnp.float32)  # post tanh

    def step(t, carry, dynamic_t):
        h, c = carry
        if dynamic_t:
            row = pl.multiple_of(t * BB, 8)
            p_t = pre_ref[pl.ds(row, BB), :]
        else:
            p_t = pre_ref[pl.ds(t * BB, BB), :]
        gates = p_t + jnp.dot(h, whh, preferred_element_type=jnp.float32)
        th = jnp.tanh(gates * scale)          # one EUP pass per step
        act = th * scale + offset             # single affine (was a select)
        i_g = act[:, 0 * H:1 * H]
        f_g = act[:, 1 * H:2 * H]
        g_g = act[:, 2 * H:3 * H]
        o_g = act[:, 3 * H:4 * H]
        c = f_g * c + i_g * g_g
        h = o_g * jnp.tanh(c)
        return h, c

    h = jnp.zeros((BB, H), jnp.float32)
    c = jnp.zeros((BB, H), jnp.float32)

    if T <= 16:
        # Small static T: fully unroll; all slices static & sublane-aligned,
        # (h, c) never leave vregs.
        for t in range(T):
            h, c = step(t, (h, c), dynamic_t=False)
    else:
        # Scaling guard: keeps vreg pressure flat for long sequences.
        h, c = lax.fori_loop(
            0, T, lambda t, hc: step(t, hc, dynamic_t=True), (h, c), unroll=2)

    # Single store of the final hidden state for this chunk.
    h_out_ref[...] = h.astype(h_out_ref.dtype)


def _round_up(x, m):
    return ((x + m - 1) // m) * m


def encoder_forward(x_btf, w_ih, w_hh, b_ih, b_hh):
    """x_btf: (B, T, F) float32 (batch_first). Returns (B, H) final hidden."""
    B, T, F = x_btf.shape
    H = w_hh.shape[1]
    H4 = 4 * H

    # Batch chunking: pad batch to the f32 sublane multiple (8). For batches
    # larger than one sublane tile, split into >=2 chunks so the "parallel"
    # grid axis can be sharded across v7x's two TensorCores (extra grid steps
    # are just a cheap serial loop on v5e/v6e).
    if B <= 8:
        BB, NC = 8, 1
    else:
        BB = min(256, _round_up(-(-B // 2), 8))
        NC = -(-B // BB)
    Bp = NC * BB

    # Layout glue (fuses into one XLA copy under jit): pad batch, pack rows as
    # (chunk, time, batch-in-chunk) so every grid step's x block is one
    # contiguous, time-major (T*BB, F) slab.
    x_p = jnp.pad(x_btf, ((0, Bp - B), (0, 0), (0, 0)))           # (Bp, T, F)
    x_pack = (x_p.reshape(NC, BB, T, F)
                 .transpose(0, 2, 1, 3)
                 .reshape(NC * T * BB, F))                        # (NC*T*BB, F)

    wih_t = jnp.transpose(w_ih, (1, 0))                           # (F, 4H)
    whh_t = jnp.transpose(w_hh, (1, 0))                           # (H, 4H)
    bias = (b_ih + b_hh).reshape(1, H4)                           # (1, 4H)
    # TODO(synk): for large H, cast x_pack / wih_t / whh_t to bfloat16 (MXU
    # native on v5e/v6e/v7x) with f32 accumulation and f32 gate math; kept f32
    # here since shapes are tiny and we validate against an f32 reference.

    # Explicit VMEM budget (v5e scoped default is 16 MiB, v7x physical VMEM is
    # 64 MiB): size the limit from the actual residency plus headroom.
    est = 4 * (2 * T * BB * F                      # x block, double-buffered
               + 2 * (F * H4 + H * H4 + H4)        # weights + bias
               + 2 * BB * H                        # output block
               + T * BB * H4)                      # pre scratch
    vmem_limit = int(min(96 << 20, est + (4 << 20)))
    # TODO(synk): for very long sequences, chunk the staged projection over T
    # (pltpu.emit_pipeline inside the body) instead of keeping x + pre fully
    # resident in VMEM.

    h_out = pl.pallas_call(
        _lstm_kernel,
        out_shape=jax.ShapeDtypeStruct((Bp, H), jnp.float32),
        grid_spec=pltpu.PrefetchScalarGridSpec(
            num_scalar_prefetch=0,
            grid=(NC,),
            in_specs=[
                pl.BlockSpec((T * BB, F), lambda i: (i, 0)),   # x chunk
                pl.BlockSpec((F, H4), lambda i: (0, 0)),       # W_ih^T
                pl.BlockSpec((H, H4), lambda i: (0, 0)),       # W_hh^T
                pl.BlockSpec((1, H4), lambda i: (0, 0)),       # fused bias
            ],
            out_specs=pl.BlockSpec((BB, H), lambda i: (i, 0)),
            scratch_shapes=[pltpu.VMEM((T * BB, H4), jnp.float32)],
        ),
        compiler_params=pltpu.CompilerParams(
            dimension_semantics=("parallel",),
            vmem_limit_bytes=vmem_limit,
        ),
    )(x_pack, wih_t, whh_t, bias)

    return h_out[:B]


def _reference_lstm(x_btf, w_ih, w_hh, b_ih, b_hh):
    """Pure-JAX reference (PyTorch nn.LSTM gate order i,f,g,o)."""
    B, T, F = x_btf.shape
    H = w_hh.shape[1]

    def step(carry, x_t):
        h, c = carry
        gates = x_t @ w_ih.T + h @ w_hh.T + b_ih + b_hh
        i_g = jax.nn.sigmoid(gates[:, 0 * H:1 * H])
        f_g = jax.nn.sigmoid(gates[:, 1 * H:2 * H])
        g_g = jnp.tanh(gates[:, 2 * H:3 * H])
        o_g = jax.nn.sigmoid(gates[:, 3 * H:4 * H])
        c = f_g * c + i_g * g_g
        h = o_g * jnp.tanh(c)
        return (h, c), None

    h0 = jnp.zeros((B, H), jnp.float32)
    c0 = jnp.zeros((B, H), jnp.float32)
    (h_end, _), _ = lax.scan(step, (h0, c0), jnp.transpose(x_btf, (1, 0, 2)))
    return h_end


if __name__ == "__main__":
    # Shapes consistent with the module: batch=4, seq=8, features=16,
    # hidden_size=32 (single-layer LSTM, dropout=0).
    B, T, F, H = 4, 8, 16, 32

    key = jax.random.PRNGKey(0)
    k_x, k_wih, k_whh, k_bih, k_bhh, k_x2 = jax.random.split(key, 6)

    # PyTorch LSTM params use U(-1/sqrt(H), 1/sqrt(H)).
    bound = 1.0 / np.sqrt(H)
    x = jax.random.normal(k_x, (B, T, F), dtype=jnp.float32)
    w_ih = jax.random.uniform(k_wih, (4 * H, F), jnp.float32, -bound, bound)
    w_hh = jax.random.uniform(k_whh, (4 * H, H), jnp.float32, -bound, bound)
    b_ih = jax.random.uniform(k_bih, (4 * H,), jnp.float32, -bound, bound)
    b_hh = jax.random.uniform(k_bhh, (4 * H,), jnp.float32, -bound, bound)

    fwd = jax.jit(encoder_forward)

    h_end = fwd(x, w_ih, w_hh, b_ih, b_hh)
    jax.block_until_ready(h_end)
    h_ref = _reference_lstm(x, w_ih, w_hh, b_ih, b_hh)
    np.testing.assert_allclose(np.asarray(h_end), np.asarray(h_ref),
                               rtol=2e-4, atol=1e-4)
    assert h_end.shape == (B, H)

    # Larger batch exercises the multi-chunk "parallel" grid path (v7x 2xTC).
    B2 = 20
    x2 = jax.random.normal(k_x2, (B2, T, F), dtype=jnp.float32)
    h_end2 = fwd(x2, w_ih, w_hh, b_ih, b_hh)
    jax.block_until_ready(h_end2)
    h_ref2 = _reference_lstm(x2, w_ih, w_hh, b_ih, b_hh)
    np.testing.assert_allclose(np.asarray(h_end2), np.asarray(h_ref2),
                               rtol=2e-4, atol=1e-4)
    assert h_end2.shape == (B2, H)

    print("KERNEL_OK")
</pallas_src>

<mosaic_0001>
module attributes {stable_mosaic.version = 11 : i64} {
  func.func @_lstm_kernel(%arg0: i32, %arg1: memref<64x16xf32, #tpu.memory_space<vmem>>, %arg2: memref<16x128xf32, #tpu.memory_space<vmem>>, %arg3: memref<32x128xf32, #tpu.memory_space<vmem>>, %arg4: memref<1x128xf32, #tpu.memory_space<vmem>>, %arg5: memref<8x32xf32, #tpu.memory_space<vmem>>, %arg6: memref<64x128xf32, #tpu.memory_space<vmem>>) attributes {dimension_semantics = [#tpu.dimension_semantics<parallel>], iteration_bounds = array<i64: 1>, scalar_prefetch = 0 : i64, scratch_operands = 1 : i64, tpu.core_type = #tpu.core_type<tc>, window_params = [{transform_indices = @transform_0, window_bounds = array<i64: 64, 16>}, {pipeline_mode = #tpu.pipeline_mode<synchronous>, transform_indices = @transform_1, window_bounds = array<i64: 16, 128>}, {pipeline_mode = #tpu.pipeline_mode<synchronous>, transform_indices = @transform_2, window_bounds = array<i64: 32, 128>}, {pipeline_mode = #tpu.pipeline_mode<synchronous>, transform_indices = @transform_3, window_bounds = array<i64: 1, 128>}, {transform_indices = @transform_4, window_bounds = array<i64: 8, 32>}]} {
    %c0 = arith.constant 0 : index
    %c0_0 = arith.constant 0 : index
    %0 = vector.load %arg1[%c0, %c0_0] : memref<64x16xf32, #tpu.memory_space<vmem>>, vector<64x16xf32>
    %c0_1 = arith.constant 0 : index
    %c0_2 = arith.constant 0 : index
    %1 = vector.load %arg2[%c0_1, %c0_2] : memref<16x128xf32, #tpu.memory_space<vmem>>, vector<16x128xf32>
    %cst = arith.constant dense<0.000000e+00> : vector<64x128xf32>
    %2 = tpu.matmul %0, %1, %cst {dimension_numbers = #tpu.dot_dimension_numbers<[1], [0], [0], [1], [0, 0, 1, 1], [], []>} : vector<64x16xf32>, vector<16x128xf32>, vector<64x128xf32> -> vector<64x128xf32>
    %c0_3 = arith.constant 0 : index
    %c0_4 = arith.constant 0 : index
    %3 = vector.load %arg4[%c0_3, %c0_4] : memref<1x128xf32, #tpu.memory_space<vmem>>, vector<1x128xf32>
    %4 = vector.broadcast %3 : vector<1x128xf32> to vector<64x128xf32>
    %5 = arith.addf %2, %4 : vector<64x128xf32>
    %c0_5 = arith.constant 0 : index
    %c0_6 = arith.constant 0 : index
    %6 = vector.load %arg6[%c0_5, %c0_6] : memref<64x128xf32, #tpu.memory_space<vmem>>, vector<64x128xf32>
    tpu.vector_store %arg6[%c0_5, %c0_6], %5 {strides = array<i32>} : memref<64x128xf32, #tpu.memory_space<vmem>>, vector<64x128xf32>,
    %c0_7 = arith.constant 0 : index
    %c0_8 = arith.constant 0 : index
    %7 = vector.load %arg3[%c0_7, %c0_8] : memref<32x128xf32, #tpu.memory_space<vmem>>, vector<32x128xf32>
    %8 = tpu.iota {dimensions = array<i32: 1>} : vector<8x128xi32>
    %c64_i32 = arith.constant 64 : i32
    %9 = vector.broadcast %c64_i32 : i32 to vector<8x128xi32>
    %10 = arith.cmpi sge, %8, %9 : vector<8x128xi32>
    %c96_i32 = arith.constant 96 : i32
    %11 = vector.broadcast %c96_i32 : i32 to vector<8x128xi32>
    %12 = arith.cmpi slt, %8, %11 : vector<8x128xi32>
    %13 = arith.andi %10, %12 : vector<8x128xi1>
    %cst_9 = arith.constant 1.000000e+00 : f32
    %cst_10 = arith.constant 5.000000e-01 : f32
    %14 = vector.broadcast %cst_9 : f32 to vector<8x128xf32>
    %15 = vector.broadcast %cst_10 : f32 to vector<8x128xf32>
    %16 = arith.select %13, %14, %15 : vector<8x128xi1>, vector<8x128xf32>
    %cst_11 = arith.constant 0.000000e+00 : f32
    %cst_12 = arith.constant 5.000000e-01 : f32
    %17 = vector.broadcast %cst_11 : f32 to vector<8x128xf32>
    %18 = vector.broadcast %cst_12 : f32 to vector<8x128xf32>
    %19 = arith.select %13, %17, %18 : vector<8x128xi1>, vector<8x128xf32>
    %cst_13 = arith.constant 0.000000e+00 : f32
    %20 = vector.broadcast %cst_13 : f32 to vector<8x32xf32>
    %cst_14 = arith.constant 0.000000e+00 : f32
    %21 = vector.broadcast %cst_14 : f32 to vector<8x32xf32>
    %c0_15 = arith.constant 0 : index
    %c0_16 = arith.constant 0 : index
    %22 = vector.load %arg6[%c0_15, %c0_16] : memref<64x128xf32, #tpu.memory_space<vmem>>, vector<8x128xf32>
    %cst_17 = arith.constant dense<0.000000e+00> : vector<8x128xf32>
    %23 = tpu.matmul %20, %7, %cst_17 {dimension_numbers = #tpu.dot_dimension_numbers<[1], [0], [0], [1], [0, 0, 1, 1], [], []>} : vector<8x32xf32>, vector<32x128xf32>, vector<8x128xf32> -> vector<8x128xf32>
    %24 = arith.addf %22, %23 : vector<8x128xf32>
    %25 = arith.mulf %24, %16 : vector<8x128xf32>
    %26 = math.tanh %25 : vector<8x128xf32>
    %27 = arith.mulf %26, %16 : vector<8x128xf32>
    %28 = arith.addf %27, %19 : vector<8x128xf32>
    %29 = vector.extract_strided_slice %28 {offsets = [0, 0], sizes = [8, 32], strides = [1, 1]} : vector<8x128xf32> to vector<8x32xf32>
    %30 = vector.extract_strided_slice %28 {offsets = [0, 32], sizes = [8, 32], strides = [1, 1]} : vector<8x128xf32> to vector<8x32xf32>
    %31 = vector.extract_strided_slice %28 {offsets = [0, 64], sizes = [8, 32], strides = [1, 1]} : vector<8x128xf32> to vector<8x32xf32>
    %32 = vector.extract_strided_slice %28 {offsets = [0, 96], sizes = [8, 32], strides = [1, 1]} : vector<8x128xf32> to vector<8x32xf32>
    %33 = arith.mulf %30, %21 : vector<8x32xf32>
    %34 = arith.mulf %29, %31 : vector<8x32xf32>
    %35 = arith.addf %33, %34 : vector<8x32xf32>
    %36 = math.tanh %35 : vector<8x32xf32>
    %37 = arith.mulf %32, %36 : vector<8x32xf32>
    %c8 = arith.constant 8 : index
    %c0_18 = arith.constant 0 : index
    %38 = vector.load %arg6[%c8, %c0_18] : memref<64x128xf32, #tpu.memory_space<vmem>>, vector<8x128xf32>
    %cst_19 = arith.constant dense<0.000000e+00> : vector<8x128xf32>
    %39 = tpu.matmul %37, %7, %cst_19 {dimension_numbers = #tpu.dot_dimension_numbers<[1], [0], [0], [1], [0, 0, 1, 1], [], []>} : vector<8x32xf32>, vector<32x128xf32>, vector<8x128xf32> -> vector<8x128xf32>
    %40 = arith.addf %38, %39 : vector<8x128xf32>
    %41 = arith.mulf %40, %16 : vector<8x128xf32>
    %42 = math.tanh %41 : vector<8x128xf32>
    %43 = arith.mulf %42, %16 : vector<8x128xf32>
    %44 = arith.addf %43, %19 : vector<8x128xf32>
    %45 = vector.extract_strided_slice %44 {offsets = [0, 0], sizes = [8, 32], strides = [1, 1]} : vector<8x128xf32> to vector<8x32xf32>
    %46 = vector.extract_strided_slice %44 {offsets = [0, 32], sizes = [8, 32], strides = [1, 1]} : vector<8x128xf32> to vector<8x32xf32>
    %47 = vector.extract_strided_slice %44 {offsets = [0, 64], sizes = [8, 32], strides = [1, 1]} : vector<8x128xf32> to vector<8x32xf32>
    %48 = vector.extract_strided_slice %44 {offsets = [0, 96], sizes = [8, 32], strides = [1, 1]} : vector<8x128xf32> to vector<8x32xf32>
    %49 = arith.mulf %46, %35 : vector<8x32xf32>
    %50 = arith.mulf %45, %47 : vector<8x32xf32>
    %51 = arith.addf %49, %50 : vector<8x32xf32>
    %52 = math.tanh %51 : vector<8x32xf32>
    %53 = arith.mulf %48, %52 : vector<8x32xf32>
    %c16 = arith.constant 16 : index
    %c0_20 = arith.constant 0 : index
    %54 = vector.load %arg6[%c16, %c0_20] : memref<64x128xf32, #tpu.memory_space<vmem>>, vector<8x128xf32>
    %cst_21 = arith.constant dense<0.000000e+00> : vector<8x128xf32>
    %55 = tpu.matmul %53, %7, %cst_21 {dimension_numbers = #tpu.dot_dimension_numbers<[1], [0], [0], [1], [0, 0, 1, 1], [], []>} : vector<8x32xf32>, vector<32x128xf32>, vector<8x128xf32> -> vector<8x128xf32>
    %56 = arith.addf %54, %55 : vector<8x128xf32>
    %57 = arith.mulf %56, %16 : vector<8x128xf32>
    %58 = math.tanh %57 : vector<8x128xf32>
    %59 = arith.mulf %58, %16 : vector<8x128xf32>
    %60 = arith.addf %59, %19 : vector<8x128xf32>
    %61 = vector.extract_strided_slice %60 {offsets = [0, 0], sizes = [8, 32], strides = [1, 1]} : vector<8x128xf32> to vector<8x32xf32>
    %62 = vector.extract_strided_slice %60 {offsets = [0, 32], sizes = [8, 32], strides = [1, 1]} : vector<8x128xf32> to vector<8x32xf32>
    %63 = vector.extract_strided_slice %60 {offsets = [0, 64], sizes = [8, 32], strides = [1, 1]} : vector<8x128xf32> to vector<8x32xf32>
    %64 = vector.extract_strided_slice %60 {offsets = [0, 96], sizes = [8, 32], strides = [1, 1]} : vector<8x128xf32> to vector<8x32xf32>
    %65 = arith.mulf %62, %51 : vector<8x32xf32>
    %66 = arith.mulf %61, %63 : vector<8x32xf32>
    %67 = arith.addf %65, %66 : vector<8x32xf32>
    %68 = math.tanh %67 : vector<8x32xf32>
    %69 = arith.mulf %64, %68 : vector<8x32xf32>
    %c24 = arith.constant 24 : index
    %c0_22 = arith.constant 0 : index
    %70 = vector.load %arg6[%c24, %c0_22] : memref<64x128xf32, #tpu.memory_space<vmem>>, vector<8x128xf32>
    %cst_23 = arith.constant dense<0.000000e+00> : vector<8x128xf32>
    %71 = tpu.matmul %69, %7, %cst_23 {dimension_numbers = #tpu.dot_dimension_numbers<[1], [0], [0], [1], [0, 0, 1, 1], [], []>} : vector<8x32xf32>, vector<32x128xf32>, vector<8x128xf32> -> vector<8x128xf32>
    %72 = arith.addf %70, %71 : vector<8x128xf32>
    %73 = arith.mulf %72, %16 : vector<8x128xf32>
    %74 = math.tanh %73 : vector<8x128xf32>
    %75 = arith.mulf %74, %16 : vector<8x128xf32>
    %76 = arith.addf %75, %19 : vector<8x128xf32>
    %77 = vector.extract_strided_slice %76 {offsets = [0, 0], sizes = [8, 32], strides = [1, 1]} : vector<8x128xf32> to vector<8x32xf32>
    %78 = vector.extract_strided_slice %76 {offsets = [0, 32], sizes = [8, 32], strides = [1, 1]} : vector<8x128xf32> to vector<8x32xf32>
    %79 = vector.extract_strided_slice %76 {offsets = [0, 64], sizes = [8, 32], strides = [1, 1]} : vector<8x128xf32> to vector<8x32xf32>
    %80 = vector.extract_strided_slice %76 {offsets = [0, 96], sizes = [8, 32], strides = [1, 1]} : vector<8x128xf32> to vector<8x32xf32>
    %81 = arith.mulf %78, %67 : vector<8x32xf32>
    %82 = arith.mulf %77, %79 : vector<8x32xf32>
    %83 = arith.addf %81, %82 : vector<8x32xf32>
    %84 = math.tanh %83 : vector<8x32xf32>
    %85 = arith.mulf %80, %84 : vector<8x32xf32>
    %c32 = arith.constant 32 : index
    %c0_24 = arith.constant 0 : index
    %86 = vector.load %arg6[%c32, %c0_24] : memref<64x128xf32, #tpu.memory_space<vmem>>, vector<8x128xf32>
    %cst_25 = arith.constant dense<0.000000e+00> : vector<8x128xf32>
    %87 = tpu.matmul %85, %7, %cst_25 {dimension_numbers = #tpu.dot_dimension_numbers<[1], [0], [0], [1], [0, 0, 1, 1], [], []>} : vector<8x32xf32>, vector<32x128xf32>, vector<8x128xf32> -> vector<8x128xf32>
    %88 = arith.addf %86, %87 : vector<8x128xf32>
    %89 = arith.mulf %88, %16 : vector<8x128xf32>
    %90 = math.tanh %89 : vector<8x128xf32>
    %91 = arith.mulf %90, %16 : vector<8x128xf32>
    %92 = arith.addf %91, %19 : vector<8x128xf32>
    %93 = vector.extract_strided_slice %92 {offsets = [0, 0], sizes = [8, 32], strides = [1, 1]} : vector<8x128xf32> to vector<8x32xf32>
    %94 = vector.extract_strided_slice %92 {offsets = [0, 32], sizes = [8, 32], strides = [1, 1]} : vector<8x128xf32> to vector<8x32xf32>
    %95 = vector.extract_strided_slice %92 {offsets = [0, 64], sizes = [8, 32], strides = [1, 1]} : vector<8x128xf32> to vector<8x32xf32>
    %96 = vector.extract_strided_slice %92 {offsets = [0, 96], sizes = [8, 32], strides = [1, 1]} : vector<8x128xf32> to vector<8x32xf32>
    %97 = arith.mulf %94, %83 : vector<8x32xf32>
    %98 = arith.mulf %93, %95 : vector<8x32xf32>
    %99 = arith.addf %97, %98 : vector<8x32xf32>
    %100 = math.tanh %99 : vector<8x32xf32>
    %101 = arith.mulf %96, %100 : vector<8x32xf32>
    %c40 = arith.constant 40 : index
    %c0_26 = arith.constant 0 : index
    %102 = vector.load %arg6[%c40, %c0_26] : memref<64x128xf32, #tpu.memory_space<vmem>>, vector<8x128xf32>
    %cst_27 = arith.constant dense<0.000000e+00> : vector<8x128xf32>
    %103 = tpu.matmul %101, %7, %cst_27 {dimension_numbers = #tpu.dot_dimension_numbers<[1], [0], [0], [1], [0, 0, 1, 1], [], []>} : vector<8x32xf32>, vector<32x128xf32>, vector<8x128xf32> -> vector<8x128xf32>
    %104 = arith.addf %102, %103 : vector<8x128xf32>
    %105 = arith.mulf %104, %16 : vector<8x128xf32>
    %106 = math.tanh %105 : vector<8x128xf32>
    %107 = arith.mulf %106, %16 : vector<8x128xf32>
    %108 = arith.addf %107, %19 : vector<8x128xf32>
    %109 = vector.extract_strided_slice %108 {offsets = [0, 0], sizes = [8, 32], strides = [1, 1]} : vector<8x128xf32> to vector<8x32xf32>
    %110 = vector.extract_strided_slice %108 {offsets = [0, 32], sizes = [8, 32], strides = [1, 1]} : vector<8x128xf32> to vector<8x32xf32>
    %111 = vector.extract_strided_slice %108 {offsets = [0, 64], sizes = [8, 32], strides = [1, 1]} : vector<8x128xf32> to vector<8x32xf32>
    %112 = vector.extract_strided_slice %108 {offsets = [0, 96], sizes = [8, 32], strides = [1, 1]} : vector<8x128xf32> to vector<8x32xf32>
    %113 = arith.mulf %110, %99 : vector<8x32xf32>
    %114 = arith.mulf %109, %111 : vector<8x32xf32>
    %115 = arith.addf %113, %114 : vector<8x32xf32>
    %116 = math.tanh %115 : vector<8x32xf32>
    %117 = arith.mulf %112, %116 : vector<8x32xf32>
    %c48 = arith.constant 48 : index
    %c0_28 = arith.constant 0 : index
    %118 = vector.load %arg6[%c48, %c0_28] : memref<64x128xf32, #tpu.memory_space<vmem>>, vector<8x128xf32>
    %cst_29 = arith.constant dense<0.000000e+00> : vector<8x128xf32>
    %119 = tpu.matmul %117, %7, %cst_29 {dimension_numbers = #tpu.dot_dimension_numbers<[1], [0], [0], [1], [0, 0, 1, 1], [], []>} : vector<8x32xf32>, vector<32x128xf32>, vector<8x128xf32> -> vector<8x128xf32>
    %120 = arith.addf %118, %119 : vector<8x128xf32>
    %121 = arith.mulf %120, %16 : vector<8x128xf32>
    %122 = math.tanh %121 : vector<8x128xf32>
    %123 = arith.mulf %122, %16 : vector<8x128xf32>
    %124 = arith.addf %123, %19 : vector<8x128xf32>
    %125 = vector.extract_strided_slice %124 {offsets = [0, 0], sizes = [8, 32], strides = [1, 1]} : vector<8x128xf32> to vector<8x32xf32>
    %126 = vector.extract_strided_slice %124 {offsets = [0, 32], sizes = [8, 32], strides = [1, 1]} : vector<8x128xf32> to vector<8x32xf32>
    %127 = vector.extract_strided_slice %124 {offsets = [0, 64], sizes = [8, 32], strides = [1, 1]} : vector<8x128xf32> to vector<8x32xf32>
    %128 = vector.extract_strided_slice %124 {offsets = [0, 96], sizes = [8, 32], strides = [1, 1]} : vector<8x128xf32> to vector<8x32xf32>
    %129 = arith.mulf %126, %115 : vector<8x32xf32>
    %130 = arith.mulf %125, %127 : vector<8x32xf32>
    %131 = arith.addf %129, %130 : vector<8x32xf32>
    %132 = math.tanh %131 : vector<8x32xf32>
    %133 = arith.mulf %128, %132 : vector<8x32xf32>
    %c56 = arith.constant 56 : index
    %c0_30 = arith.constant 0 : index
    %134 = vector.load %arg6[%c56, %c0_30] : memref<64x128xf32, #tpu.memory_space<vmem>>, vector<8x128xf32>
    %cst_31 = arith.constant dense<0.000000e+00> : vector<8x128xf32>
    %135 = tpu.matmul %133, %7, %cst_31 {dimension_numbers = #tpu.dot_dimension_numbers<[1], [0], [0], [1], [0, 0, 1, 1], [], []>} : vector<8x32xf32>, vector<32x128xf32>, vector<8x128xf32> -> vector<8x128xf32>
    %136 = arith.addf %134, %135 : vector<8x128xf32>
    %137 = arith.mulf %136, %16 : vector<8x128xf32>
    %138 = math.tanh %137 : vector<8x128xf32>
    %139 = arith.mulf %138, %16 : vector<8x128xf32>
    %140 = arith.addf %139, %19 : vector<8x128xf32>
    %141 = vector.extract_strided_slice %140 {offsets = [0, 0], sizes = [8, 32], strides = [1, 1]} : vector<8x128xf32> to vector<8x32xf32>
    %142 = vector.extract_strided_slice %140 {offsets = [0, 32], sizes = [8, 32], strides = [1, 1]} : vector<8x128xf32> to vector<8x32xf32>
    %143 = vector.extract_strided_slice %140 {offsets = [0, 64], sizes = [8, 32], strides = [1, 1]} : vector<8x128xf32> to vector<8x32xf32>
    %144 = vector.extract_strided_slice %140 {offsets = [0, 96], sizes = [8, 32], strides = [1, 1]} : vector<8x128xf32> to vector<8x32xf32>
    %145 = arith.mulf %142, %131 : vector<8x32xf32>
    %146 = arith.mulf %141, %143 : vector<8x32xf32>
    %147 = arith.addf %145, %146 : vector<8x32xf32>
    %148 = math.tanh %147 : vector<8x32xf32>
    %149 = arith.mulf %144, %148 : vector<8x32xf32>
    %c0_32 = arith.constant 0 : index
    %c0_33 = arith.constant 0 : index
    %150 = vector.load %arg5[%c0_32, %c0_33] : memref<8x32xf32, #tpu.memory_space<vmem>>, vector<8x32xf32>
    tpu.vector_store %arg5[%c0_32, %c0_33], %149 {strides = array<i32>} : memref<8x32xf32, #tpu.memory_space<vmem>>, vector<8x32xf32>,
    return
  }
  func.func @transform_0(%arg0: i32) -> (i32, i32) {
    %c0_i32 = arith.constant 0 : i32
    %c0_i32_0 = arith.constant 0 : i32
    return %arg0, %c0_i32 : i32, i32
  }
  func.func @transform_1(%arg0: i32) -> (i32, i32) {
    %c0_i32 = arith.constant 0 : i32
    %c0_i32_0 = arith.constant 0 : i32
    %c0_i32_1 = arith.constant 0 : i32
    return %c0_i32, %c0_i32_0 : i32, i32
  }
  func.func @transform_2(%arg0: i32) -> (i32, i32) {
    %c0_i32 = arith.constant 0 : i32
    %c0_i32_0 = arith.constant 0 : i32
    %c0_i32_1 = arith.constant 0 : i32
    return %c0_i32, %c0_i32_0 : i32, i32
  }
  func.func @transform_3(%arg0: i32) -> (i32, i32) {
    %c0_i32 = arith.constant 0 : i32
    %c0_i32_0 = arith.constant 0 : i32
    %c0_i32_1 = arith.constant 0 : i32
    return %c0_i32, %c0_i32_0 : i32, i32
  }
  func.func @transform_4(%arg0: i32) -> (i32, i32) {
    %c0_i32 = arith.constant 0 : i32
    %c0_i32_0 = arith.constant 0 : i32
    return %arg0, %c0_i32 : i32, i32
  }
}

</mosaic_0001>

<bundles_post_ra>
// kernel: encoder_forward.1
= control target key start
LH: loop header
LB: loop body
LE: loop exit
PB: predicated region body
PF: predicated region fallthrough
CT: control target
= control target key end

     0   :  { %v1182_v0 = vmov 0.0   ;;  %vm1183_vm0 = vmmov 0   ;;  %vm34_vm1 = vcmask 130048   ;;  %v176_v9 = vlaneseq  ;;  %s1186_s5 = smov 32   ;;  %s1447_s1 = inlined_call_operand.vmem [shape: f32[16,128], index: 1, kind: input, shape index: {}]   ;;  %s1448_s2 = inlined_call_operand.vmem [shape: f32[32,128], index: 2, kind: input, shape index: {}]   ;;  %s1449_s0 = inlined_call_operand.vmem [shape: f32[64,16], index: 0, kind: input, shape index: {}]   ;;  %s1450_s3 = inlined_call_operand.vmem [shape: f32[1,128], index: 3, kind: input, shape index: {}]   ;;  %s1451_s4 = inlined_call_operand.vmem [shape: f32[8,32], index: 4, kind: output, shape index: {}]  }
   0x1   :  { %1057 = vmatprep.subr.mxu1 %v1182_v0  ;;  %v26_v1 = vld [vmem:[%s1447_s1 + $0x8] sm:$0xff]  ;;  %v1219_v2 = vld [vmem:[%s1448_s2 + $0x18] sm:$0xff]  ;;  %v25_v3 = vld [vmem:[%s1447_s1] sm:$0xff]  ;;  %1065 = vmatprep.mubr.msk.f32.mxu1 %vm1183_vm0, %v1182_v0  ;;  %v1184_v15 = vmov 0.5   ;;  %vm184_vm5 = vcmask 261120  }
   0x2   :  { %1041 = vmatprep.subr.mxu0 %v26_v1  ;;  %1058 = vmatpush3.msra.mxu1 %v1219_v2  ;;  %v1230_v4 = vld [vmem:[%s1448_s2 + $0x10] sm:$0xff]  ;;  %v17_v5 = vld [vmem:[%s1449_s0] sm:$0xff]  ;;  %v18_v6 = vld [vmem:[%s1449_s0 + $0x8] sm:$0xff]  ;;  %v177_v10 = vand.u32 127, %v176_v9 }
   0x3   :  { %1042 = vmatpush3.msra.mxu0 %v26_v1  ;;  %1059 = vmatprep.subr.mxu1 %v1182_v0  ;;  %v1243_v7 = vld [vmem:[%s1448_s2 + $0x8] sm:$0xff]  ;;  %v1251_v8 = vld [vmem:[%s1448_s2] sm:$0xff]  ;;  %v19_v47 = vld [vmem:[%s1449_s0 + $0x10] sm:$0xff] }
   0x4   :  { %1043 = vmatprep.subr.mxu0 %v25_v3  ;;  %1060 = vmatpush3.msra.mxu1 %v1230_v4  ;;  %vm178_vm2 = vcmp.ge.s32.totalorder %v177_v10, 64  ;;  %vm179_vm3 = vcmp.lt.s32.totalorder %v177_v10, 96  ;;  %v1280_v12 = vld [vmem:[%s1450_s3] ss:$0 sm:$0xff]  ;;  %s1185_s3 = smov 64   ;;  %v20_v48 = vld [vmem:[%s1449_s0 + $0x18] sm:$0xff] }
   0x5   :  { %1044 = vmatpush3.msra.mxu0 %v25_v3  ;;  %1045 = vmatprep.mubr.msk.f32.mxu0 %vm34_vm1, %v17_v5  ;;  %vm180_vm4 = vmand %vm178_vm2, %vm179_vm3  ;;  %v21_v49 = vld [vmem:[%s1449_s0 + $0x20] sm:$0xff]  ;;  %v22_v50 = vld [vmem:[%s1449_s0 + $0x28] sm:$0xff] }
   0x6   :  { %1061 = vmatprep.subr.mxu1 %v1182_v0  ;;  %1046 = vmatmul.mubr.msk.f32.vlgmr.msra.gmra.mxu0 %vm34_vm1, %v18_v6  ;;  %v1283_v16 = vsel %vm180_vm4, 1.0, %v1184_v15  ;;  %v1286_v22 = vsel %vm180_vm4, 0.0, %v1184_v15  ;;  %v23_v51 = vld [vmem:[%s1449_s0 + $0x30] sm:$0xff]  ;;  %v24_v52 = vld [vmem:[%s1449_s0 + $0x38] sm:$0xff] }
   0x7   :  { %1062 = vmatpush3.msra.mxu1 %v1243_v7  ;;  %1079 = vmatprep.subr.mxu0 %v1182_v0 }
   0x8   :  { %1063 = vmatprep.subr.mxu1 %v1182_v0  ;;  %1080 = vmatpush3.msra.mxu0 %v1219_v2 }
   0x9   :  { %1064 = vmatpush3.msra.mxu1 %v1251_v8  ;;  %1081 = vmatprep.subr.mxu0 %v1182_v0 }
   0xa   :  { %1066 = vmatmul.mubr.f32.vlgmr.msra.gmra.mxu1 %v1182_v0  ;;  %1068 = vmatprep.subr.mxu1 %v1182_v0 }
   0xb   :  { %1069 = vmatpush3.msra.mxu1 %v1219_v2  ;;  %1076 = vmatprep.mubr.msk.f32.mxu1 %vm1183_vm0, %v1182_v0 }
   0xc   :  { %1070 = vmatprep.subr.mxu1 %v1182_v0  ;;  %1082 = vmatpush3.msra.mxu0 %v1230_v4 }
   0xd   :  { %1071 = vmatpush3.msra.mxu1 %v1230_v4  ;;  %1083 = vmatprep.subr.mxu0 %v1182_v0 }
   0xe   :  { %1072 = vmatprep.subr.mxu1 %v1182_v0  ;;  %1084 = vmatpush3.msra.mxu0 %v1243_v7 }
   0xf   :  { %1073 = vmatpush3.msra.mxu1 %v1243_v7  ;;  %1085 = vmatprep.subr.mxu0 %v1182_v0 }
  0x10   :  { %1074 = vmatprep.subr.mxu1 %v1182_v0  ;;  %1086 = vmatpush3.msra.mxu0 %v1251_v8 }
  0x11   :  { %1075 = vmatpush3.msra.mxu1 %v1251_v8  ;;  %1101 = vmatprep.subr.mxu0 %v1182_v0 }
  0x12   :  { %1090 = vmatprep.subr.mxu1 %v1182_v0  ;;  %1048 = vmatprep.mubr.msk.f32.mxu0 %vm34_vm1, %v19_v47 }
  0x13   :  { %1049 = vmatmul.mubr.msk.f32.gmra.mxu0 %vm34_vm1, %v20_v48 }
  0x14   :  { %1051 = vmatprep.mubr.msk.f32.mxu0 %vm34_vm1, %v21_v49 }
  0x17   :  { %1052 = vmatmul.mubr.msk.f32.gmra.mxu0 %vm34_vm1, %v22_v50 }
  0x18   :  { %1054 = vmatprep.mubr.msk.f32.mxu0 %vm34_vm1, %v23_v51 }
  0x1b   :  { %1055 = vmatmul.mubr.msk.f32.gmra.mxu0 %vm34_vm1, %v24_v52 }
  0x1c   :  { %1087 = vmatprep.mubr.msk.f32.mxu0 %vm1183_vm0, %v1182_v0 }
  0xc6   :  { %v1047_v11 = vpop.f32.mrf.mxu0 }
  0xc7   :  { %v131_v34 = vadd.f32 %v1047_v11, %v1280_v12 }
  0xc8   :  { %v125_v13 = vpop.f32.mrf.mxu0 }
  0xc9   :  { %v126_v14 = vadd.f32 %v1280_v12, %v125_v13 }
  0xca   :  { %v254_v17 = vpop.f32.mrf.mxu1 }
  0xcb   :  { %v258_v18 = vadd.f32 %v254_v17, %v126_v14 }
  0xcc   :  { %v1067_v19 = vpop.f32.mrf.mxu1 }
  0xcd   :  { %v259_v20 = vmul.f32 %v258_v18, %v1283_v16 }
  0xcf   :  { %1150 = vtanh.f32 %v259_v20 }
  0xd3   :  { %v1050_v57 = vpop.f32.mrf.mxu0 }
  0xd5   :  { %v135_v58 = vpop.f32.mrf.mxu0 }
  0xd6   :  { %v136_v63 = vadd.f32 %v1280_v12, %v135_v58 }
  0xd7   :  { %v1350_v59 = vpop.f32.mrf.mxu0 }
  0xd8   :  { %v151_v58 = vadd.f32 %v1350_v59, %v1280_v12 }
  0xd9   :  { %v1352_v60 = vpop.f32.mrf.mxu0 }
  0xdb   :  { %v1354_v61 = vpop.f32.mrf.mxu0 }
  0xdc   :  { %v1151_v21 = vpop.eup %1150 }
  0xdd   :  { %v261_v23 = vmul.f32 %v1151_v21, %v1283_v16  ;;  %v1356_v62 = vpop.f32.mrf.mxu0 }
  0xdf   :  { %v262_v24 = vadd.f32 %v261_v23, %v1286_v22 }
  0xe1   :  { %265 = vrot.lane.b32.xlu0 %v262_v24, %s1185_s3  ;;  %v263_v27 = vmul.f32 0.0, %v262_v24 }
 0x153   :  { %v266_v25 = vpop.permute.xlu0 %265 }
 0x154   :  { %v268_v26 = vmul.f32 %v266_v25, %v262_v24 }
 0x156   :  { %270 = vrot.lane.b32.xlu0 %v268_v26, %s1186_s5 }
 0x1c8   :  { %v271_v28 = vpop.permute.xlu0 %270 }
 0x1c9   :  { %v273_v29 = vadd.f32 %v271_v28, %v263_v27 }
 0x1cb   :  { %1152 = vtanh.f32 %v273_v29 }
 0x1d8   :  { %v1153_v30 = vpop.eup %1152 }
 0x1d9   :  { %276 = vrot.lane.b32.xlu1 %v1153_v30, %s1185_s3 }
 0x24b   :  { %v277_v31 = vpop.permute.xlu1 %276 }
 0x24c   :  { %v279_v32 = vmul.f32 %v277_v31, %v262_v24  ;;  %v141_v24 = vadd.f32 %v1050_v57, %v1280_v12 }
 0x24e   :  { %282 = vrot.lane.b32.xlu1 %v279_v32, %s1186_s5 }
 0x2c0   :  { %v283_v33 = vpop.permute.xlu1 %282 }
 0x2c1   :  { %1077 = vmatmul.mubr.msk.f32.vlgmr.msra.gmra.mxu1 %vm184_vm5, %v283_v33 }
 0x2c2   :  { %1091 = vmatpush3.msra.mxu1 %v1219_v2  ;;  %1098 = vmatprep.mubr.msk.f32.mxu1 %vm1183_vm0, %v1182_v0 }
 0x2c3   :  { %1092 = vmatprep.subr.mxu1 %v1182_v0 }
 0x2c4   :  { %1093 = vmatpush3.msra.mxu1 %v1230_v4 }
 0x2c5   :  { %1094 = vmatprep.subr.mxu1 %v1182_v0 }
 0x2c6   :  { %1095 = vmatpush3.msra.mxu1 %v1243_v7 }
 0x2c7   :  { %1096 = vmatprep.subr.mxu1 %v1182_v0 }
 0x2c8   :  { %1097 = vmatpush3.msra.mxu1 %v1251_v8 }
 0x2c9   :  { %1112 = vmatprep.subr.mxu1 %v1182_v0 }
 0x381   :  { %v352_v35 = vpop.f32.mrf.mxu1 }
 0x382   :  { %v356_v36 = vadd.f32 %v352_v35, %v131_v34 }
 0x383   :  { %v1078_v37 = vpop.f32.mrf.mxu1 }
 0x384   :  { %v357_v38 = vmul.f32 %v356_v36, %v1283_v16 }
 0x386   :  { %1154 = vtanh.f32 %v357_v38 }
 0x393   :  { %v1155_v39 = vpop.eup %1154 }
 0x394   :  { %v359_v40 = vmul.f32 %v1155_v39, %v1283_v16 }
 0x396   :  { %v360_v41 = vadd.f32 %v359_v40, %v1286_v22 }
 0x398   :  { %363 = vrot.lane.b32.xlu0 %v360_v41, %s1185_s3  ;;  %v361_v44 = vmul.f32 %v360_v41, %v273_v29 }
 0x40a   :  { %v364_v42 = vpop.permute.xlu0 %363 }
 0x40b   :  { %v366_v43 = vmul.f32 %v364_v42, %v360_v41 }
 0x40d   :  { %368 = vrot.lane.b32.xlu1 %v366_v43, %s1186_s5 }
 0x47f   :  { %v369_v45 = vpop.permute.xlu1 %368 }
 0x480   :  { %v371_v46 = vadd.f32 %v369_v45, %v361_v44 }
 0x482   :  { %1156 = vtanh.f32 %v371_v46 }
 0x48f   :  { %v1157_v53 = vpop.eup %1156 }
 0x490   :  { %374 = vrot.lane.b32.xlu0 %v1157_v53, %s1185_s3 }
 0x502   :  { %v375_v54 = vpop.permute.xlu0 %374 }
 0x503   :  { %v377_v55 = vmul.f32 %v375_v54, %v360_v41  ;;  %v146_v41 = vadd.f32 %v1280_v12, %v1352_v60 }
 0x505   :  { %380 = vrot.lane.b32.xlu1 %v377_v55, %s1186_s5 }
 0x577   :  { %v381_v56 = vpop.permute.xlu1 %380 }
 0x578   :  { %1088 = vmatmul.mubr.msk.f32.vlgmr.msra.gmra.mxu0 %vm184_vm5, %v381_v56 }
 0x579   :  { %1102 = vmatpush3.msra.mxu0 %v1219_v2  ;;  %1109 = vmatprep.mubr.msk.f32.mxu0 %vm1183_vm0, %v1182_v0 }
 0x57a   :  { %1103 = vmatprep.subr.mxu0 %v1182_v0 }
 0x57b   :  { %1104 = vmatpush3.msra.mxu0 %v1230_v4 }
 0x57c   :  { %1105 = vmatprep.subr.mxu0 %v1182_v0 }
 0x57d   :  { %1106 = vmatpush3.msra.mxu0 %v1243_v7 }
 0x57e   :  { %1107 = vmatprep.subr.mxu0 %v1182_v0 }
 0x57f   :  { %1108 = vmatpush3.msra.mxu0 %v1251_v8 }
 0x580   :  { %1123 = vmatprep.subr.mxu0 %v1182_v0 }
 0x638   :  { %v450_v1 = vpop.f32.mrf.mxu0 }
 0x639   :  { %v454_v3 = vadd.f32 %v450_v1, %v136_v63 }
 0x63a   :  { %v1089_v5 = vpop.f32.mrf.mxu0 }
 0x63b   :  { %v455_v6 = vmul.f32 %v454_v3, %v1283_v16 }
 0x63d   :  { %1158 = vtanh.f32 %v455_v6 }
 0x64a   :  { %v1159_v9 = vpop.eup %1158 }
 0x64b   :  { %v457_v10 = vmul.f32 %v1159_v9, %v1283_v16 }
 0x64d   :  { %v458_v11 = vadd.f32 %v457_v10, %v1286_v22 }
 0x64f   :  { %461 = vrot.lane.b32.xlu0 %v458_v11, %s1185_s3  ;;  %v459_v15 = vmul.f32 %v458_v11, %v371_v46 }
 0x6c1   :  { %v462_v13 = vpop.permute.xlu0 %461 }
 0x6c2   :  { %v464_v14 = vmul.f32 %v462_v13, %v458_v11 }
 0x6c4   :  { %466 = vrot.lane.b32.xlu1 %v464_v14, %s1186_s5  ;;  %v156_v14 = vadd.f32 %v1280_v12, %v1356_v62 }
 0x736   :  { %v467_v17 = vpop.permute.xlu1 %466 }
 0x737   :  { %v469_v18 = vadd.f32 %v467_v17, %v459_v15 }
 0x739   :  { %1160 = vtanh.f32 %v469_v18 }
 0x746   :  { %v1161_v19 = vpop.eup %1160 }
 0x747   :  { %472 = vrot.lane.b32.xlu0 %v1161_v19, %s1185_s3 }
 0x7b9   :  { %v473_v20 = vpop.permute.xlu0 %472 }
 0x7ba   :  { %v475_v21 = vmul.f32 %v473_v20, %v458_v11 }
 0x7bc   :  { %478 = vrot.lane.b32.xlu1 %v475_v21, %s1186_s5 }
 0x82e   :  { %v479_v23 = vpop.permute.xlu1 %478 }
 0x82f   :  { %1099 = vmatmul.mubr.msk.f32.vlgmr.msra.gmra.mxu1 %vm184_vm5, %v479_v23 }
 0x830   :  { %1113 = vmatpush3.msra.mxu1 %v1219_v2  ;;  %1120 = vmatprep.mubr.msk.f32.mxu1 %vm1183_vm0, %v1182_v0 }
 0x831   :  { %1114 = vmatprep.subr.mxu1 %v1182_v0 }
 0x832   :  { %1115 = vmatpush3.msra.mxu1 %v1230_v4 }
 0x833   :  { %1116 = vmatprep.subr.mxu1 %v1182_v0 }
 0x834   :  { %1117 = vmatpush3.msra.mxu1 %v1243_v7 }
 0x835   :  { %1118 = vmatprep.subr.mxu1 %v1182_v0 }
 0x836   :  { %1119 = vmatpush3.msra.mxu1 %v1251_v8 }
 0x837   :  { %1134 = vmatprep.subr.mxu1 %v1182_v0 }
 0x8ef   :  { %v548_v25 = vpop.f32.mrf.mxu1 }
 0x8f0   :  { %v552_v26 = vadd.f32 %v548_v25, %v141_v24 }
 0x8f1   :  { %v1100_v27 = vpop.f32.mrf.mxu1 }
 0x8f2   :  { %v553_v28 = vmul.f32 %v552_v26, %v1283_v16 }
 0x8f4   :  { %1162 = vtanh.f32 %v553_v28 }
 0x901   :  { %v1163_v29 = vpop.eup %1162 }
 0x902   :  { %v555_v30 = vmul.f32 %v1163_v29, %v1283_v16 }
 0x904   :  { %v556_v31 = vadd.f32 %v555_v30, %v1286_v22 }
 0x906   :  { %559 = vrot.lane.b32.xlu0 %v556_v31, %s1185_s3  ;;  %v557_v34 = vmul.f32 %v556_v31, %v469_v18 }
 0x978   :  { %v560_v32 = vpop.permute.xlu0 %559 }
 0x979   :  { %v562_v33 = vmul.f32 %v560_v32, %v556_v31  ;;  %v161_v32 = vadd.f32 %v1354_v61, %v1280_v12 }
 0x97b   :  { %564 = vrot.lane.b32.xlu1 %v562_v33, %s1186_s5 }
 0x9ed   :  { %v565_v35 = vpop.permute.xlu1 %564 }
 0x9ee   :  { %v567_v36 = vadd.f32 %v565_v35, %v557_v34 }
 0x9f0   :  { %1164 = vtanh.f32 %v567_v36 }
 0x9fd   :  { %v1165_v37 = vpop.eup %1164 }
 0x9fe   :  { %570 = vrot.lane.b32.xlu0 %v1165_v37, %s1185_s3 }
 0xa70   :  { %v571_v38 = vpop.permute.xlu0 %570 }
 0xa71   :  { %v573_v39 = vmul.f32 %v571_v38, %v556_v31 }
 0xa73   :  { %576 = vrot.lane.b32.xlu1 %v573_v39, %s1186_s5 }
 0xae5   :  { %v577_v40 = vpop.permute.xlu1 %576 }
 0xae6   :  { %1110 = vmatmul.mubr.msk.f32.vlgmr.msra.gmra.mxu0 %vm184_vm5, %v577_v40 }
 0xae7   :  { %1124 = vmatpush3.msra.mxu0 %v1219_v2  ;;  %1131 = vmatprep.mubr.msk.f32.mxu0 %vm1183_vm0, %v1182_v0 }
 0xae8   :  { %1125 = vmatprep.subr.mxu0 %v1182_v0 }
 0xae9   :  { %1126 = vmatpush3.msra.mxu0 %v1230_v4 }
 0xaea   :  { %1127 = vmatprep.subr.mxu0 %v1182_v0 }
 0xaeb   :  { %1128 = vmatpush3.msra.mxu0 %v1243_v7 }
 0xaec   :  { %1129 = vmatprep.subr.mxu0 %v1182_v0 }
 0xaed   :  { %1130 = vmatpush3.msra.mxu0 %v1251_v8 }
 0xba6   :  { %v646_v42 = vpop.f32.mrf.mxu0 }
 0xba7   :  { %v650_v43 = vadd.f32 %v646_v42, %v146_v41 }
 0xba8   :  { %v1111_v44 = vpop.f32.mrf.mxu0 }
 0xba9   :  { %v651_v45 = vmul.f32 %v650_v43, %v1283_v16 }
 0xbab   :  { %1166 = vtanh.f32 %v651_v45 }
 0xbb8   :  { %v1167_v46 = vpop.eup %1166 }
 0xbb9   :  { %v653_v47 = vmul.f32 %v1167_v46, %v1283_v16 }
 0xbbb   :  { %v654_v48 = vadd.f32 %v653_v47, %v1286_v22 }
 0xbbd   :  { %657 = vrot.lane.b32.xlu0 %v654_v48, %s1185_s3  ;;  %v655_v51 = vmul.f32 %v654_v48, %v567_v36 }
 0xc2f   :  { %v658_v49 = vpop.permute.xlu0 %657 }
 0xc30   :  { %v660_v50 = vmul.f32 %v658_v49, %v654_v48 }
 0xc32   :  { %662 = vrot.lane.b32.xlu1 %v660_v50, %s1186_s5 }
 0xca4   :  { %v663_v52 = vpop.permute.xlu1 %662 }
 0xca5   :  { %v665_v53 = vadd.f32 %v663_v52, %v655_v51 }
 0xca7   :  { %1168 = vtanh.f32 %v665_v53 }
 0xcb4   :  { %v1169_v54 = vpop.eup %1168 }
 0xcb5   :  { %668 = vrot.lane.b32.xlu0 %v1169_v54, %s1185_s3 }
 0xd27   :  { %v669_v55 = vpop.permute.xlu0 %668 }
 0xd28   :  { %v671_v56 = vmul.f32 %v669_v55, %v654_v48 }
 0xd2a   :  { %674 = vrot.lane.b32.xlu1 %v671_v56, %s1186_s5 }
 0xd9c   :  { %v675_v57 = vpop.permute.xlu1 %674 }
 0xd9d   :  { %1121 = vmatmul.mubr.msk.f32.vlgmr.msra.gmra.mxu1 %vm184_vm5, %v675_v57 }
 0xd9e   :  { %1135 = vmatpush3.msra.mxu1 %v1219_v2  ;;  %1142 = vmatprep.mubr.msk.f32.mxu1 %vm1183_vm0, %v1182_v0 }
 0xd9f   :  { %1136 = vmatprep.subr.mxu1 %v1182_v0 }
 0xda0   :  { %1137 = vmatpush3.msra.mxu1 %v1230_v4 }
 0xda1   :  { %1138 = vmatprep.subr.mxu1 %v1182_v0 }
 0xda2   :  { %1139 = vmatpush3.msra.mxu1 %v1243_v7 }
 0xda3   :  { %1140 = vmatprep.subr.mxu1 %v1182_v0 }
 0xda4   :  { %1141 = vmatpush3.msra.mxu1 %v1251_v8 }
 0xe5d   :  { %v744_v60 = vpop.f32.mrf.mxu1 }
 0xe5e   :  { %v748_v2 = vadd.f32 %v744_v60, %v151_v58 }
 0xe5f   :  { %v1122_v63 = vpop.f32.mrf.mxu1 }
 0xe60   :  { %v749_v1 = vmul.f32 %v748_v2, %v1283_v16 }
 0xe62   :  { %1170 = vtanh.f32 %v749_v1 }
 0xe6f   :  { %v1171_v3 = vpop.eup %1170 }
 0xe70   :  { %v751_v4 = vmul.f32 %v1171_v3, %v1283_v16 }
 0xe72   :  { %v752_v5 = vadd.f32 %v751_v4, %v1286_v22 }
 0xe74   :  { %755 = vrot.lane.b32.xlu0 %v752_v5, %s1185_s3  ;;  %v753_v8 = vmul.f32 %v752_v5, %v665_v53 }
 0xee6   :  { %v756_v7 = vpop.permute.xlu0 %755 }
 0xee7   :  { %v758_v0 = vmul.f32 %v756_v7, %v752_v5 }
 0xee9   :  { %760 = vrot.lane.b32.xlu1 %v758_v0, %s1186_s5 }
 0xf5b   :  { %v761_v6 = vpop.permute.xlu1 %760 }
 0xf5c   :  { %v763_v59 = vadd.f32 %v761_v6, %v753_v8 }
 0xf5e   :  { %1172 = vtanh.f32 %v763_v59 }
 0xf6b   :  { %v1173_v9 = vpop.eup %1172 }
 0xf6c   :  { %766 = vrot.lane.b32.xlu0 %v1173_v9, %s1185_s3 }
 0xfde   :  { %v767_v10 = vpop.permute.xlu0 %766 }
 0xfdf   :  { %v769_v11 = vmul.f32 %v767_v10, %v752_v5 }
 0xfe1   :  { %772 = vrot.lane.b32.xlu1 %v769_v11, %s1186_s5 }
0x1053   :  { %v773_v13 = vpop.permute.xlu1 %772 }
0x1054   :  { %1132 = vmatmul.mubr.msk.f32.vlgmr.msra.gmra.mxu0 %vm184_vm5, %v773_v13 }
0x1114   :  { %v842_v15 = vpop.f32.mrf.mxu0 }
0x1115   :  { %v846_v17 = vadd.f32 %v842_v15, %v156_v14 }
0x1116   :  { %v1133_v18 = vpop.f32.mrf.mxu0 }
0x1117   :  { %v847_v19 = vmul.f32 %v846_v17, %v1283_v16 }
0x1119   :  { %1174 = vtanh.f32 %v847_v19 }
0x1126   :  { %v1175_v20 = vpop.eup %1174 }
0x1127   :  { %v849_v21 = vmul.f32 %v1175_v20, %v1283_v16 }
0x1129   :  { %v850_v23 = vadd.f32 %v849_v21, %v1286_v22 }
0x112b   :  { %853 = vrot.lane.b32.xlu0 %v850_v23, %s1185_s3  ;;  %v851_v26 = vmul.f32 %v850_v23, %v763_v59 }
0x119d   :  { %v854_v24 = vpop.permute.xlu0 %853 }
0x119e   :  { %v856_v25 = vmul.f32 %v854_v24, %v850_v23 }
0x11a0   :  { %858 = vrot.lane.b32.xlu1 %v856_v25, %s1186_s5 }
0x1212   :  { %v859_v27 = vpop.permute.xlu1 %858 }
0x1213   :  { %v861_v62 = vadd.f32 %v859_v27, %v851_v26 }
0x1215   :  { %1176 = vtanh.f32 %v861_v62 }
0x1222   :  { %v1177_v28 = vpop.eup %1176 }
0x1223   :  { %864 = vrot.lane.b32.xlu0 %v1177_v28, %s1185_s3 }
0x1295   :  { %v865_v29 = vpop.permute.xlu0 %864 }
0x1296   :  { %v867_v30 = vmul.f32 %v865_v29, %v850_v23 }
0x1298   :  { %870 = vrot.lane.b32.xlu1 %v867_v30, %s1186_s5 }
0x130a   :  { %v871_v31 = vpop.permute.xlu1 %870 }
0x130b   :  { %1143 = vmatmul.mubr.msk.f32.vlgmr.msra.gmra.mxu1 %vm184_vm5, %v871_v31 }
0x13cb   :  { %v940_v33 = vpop.f32.mrf.mxu1 }
0x13cc   :  { %v944_v34 = vadd.f32 %v940_v33, %v161_v32 }
0x13cd   :  { %v1144_v35 = vpop.f32.mrf.mxu1 }
0x13ce   :  { %v945_v36 = vmul.f32 %v944_v34, %v1283_v16 }
0x13d0   :  { %1178 = vtanh.f32 %v945_v36 }
0x13dd   :  { %v1179_v37 = vpop.eup %1178 }
0x13de   :  { %v947_v38 = vmul.f32 %v1179_v37, %v1283_v16 }
0x13e0   :  { %v948_v39 = vadd.f32 %v947_v38, %v1286_v22 }
0x13e2   :  { %951 = vrot.lane.b32.xlu0 %v948_v39, %s1185_s3  ;;  %v949_v42 = vmul.f32 %v948_v39, %v861_v62 }
0x1454   :  { %v952_v40 = vpop.permute.xlu0 %951 }
0x1455   :  { %v954_v41 = vmul.f32 %v952_v40, %v948_v39 }
0x1457   :  { %956 = vrot.lane.b32.xlu1 %v954_v41, %s1186_s5 }
0x14c9   :  { %v957_v43 = vpop.permute.xlu1 %956 }
0x14ca   :  { %v959_v12 = vadd.f32 %v957_v43, %v949_v42 }
0x14cc   :  { %1180 = vtanh.f32 %v959_v12 }
0x14d9   :  { %v1181_v61 = vpop.eup %1180 }
0x14da   :  { %962 = vrot.lane.b32.xlu0 %v1181_v61, %s1185_s3 }
0x154c   :  { %v963_v44 = vpop.permute.xlu0 %962 }
0x154d   :  { %v965_v45 = vmul.f32 %v963_v44, %v948_v39 }
0x154f   :  { %967 = vrot.lane.b32.xlu1 %v965_v45, %s1186_s5 }
0x15c1   :  { %v968_v16 = vpop.permute.xlu1 %967 }
0x15c2   :  { %970 = vst.msk [vmem:[%s1451_s4] sm:$0xff] %vm184_vm5, %v968_v16 }

</bundles_post_ra>
